<compile_context>
chip_gen: v5e
topology: v5e:2x2
jax: 0.10.0
libtpu: 0.0.40
codegen_flags: <defaults>
</compile_context>

<pallas_src>
import functools

import jax
import jax.numpy as jnp
from jax.experimental import pallas as pl
from jax.experimental.pallas import tpu as pltpu

_THRESHOLD = 20.0            # torch.nn.Softplus default threshold
_MIN_KERNEL_BYTES = 1 << 20  # below this, XLA's fused elementwise op wins


def _softplus_kernel(x_ref, o_ref, *, compute_dtype):
    # Softplus with beta=1, threshold=20 (torch.nn.Softplus defaults):
    #   y = log1p(exp(x))  if x <= 20
    #   y = x              otherwise
    x = x_ref[...].astype(compute_dtype)
    thr = jnp.asarray(_THRESHOLD, compute_dtype)
    safe = jnp.minimum(x, thr)               # keep exp from overflowing
    soft = jnp.log1p(jnp.exp(safe))
    o_ref[...] = jnp.where(x > thr, x, soft).astype(o_ref.dtype)


def _softplus_ref(x):
    """Plain-JAX reference / fallback (same semantics as the kernel)."""
    xf = x.astype(jnp.float32)
    y = jnp.where(
        xf > _THRESHOLD,
        xf,
        jnp.log1p(jnp.exp(jnp.minimum(xf, _THRESHOLD))),
    )
    return y.astype(x.dtype)


def _round_up(a, b):
    return ((a + b - 1) // b) * b


def _chip_params():
    """Trace-time, generation-aware tiling parameters."""
    kind = ""
    try:
        kind = jax.devices()[0].device_kind.lower()
    except Exception:
        pass
    if "v7" in kind:
        # 3.2 TB/s HBM, 64 MiB physical VMEM, 2 TensorCores per chip.
        return {"block_bytes": 8 << 20, "vmem_limit": 48 << 20,
                "min_grid": 2, "bf16_native": True}
    if "v6" in kind:
        # 1.4 TB/s HBM; 4 x 6 MiB double-buffered fits 32 MiB default scoped VMEM.
        return {"block_bytes": 6 << 20, "vmem_limit": None,
                "min_grid": 1, "bf16_native": True}
    # v5e (16 MiB default scoped VMEM, 0.82 TB/s) and unknown chips: conservative.
    return {"block_bytes": 2 << 20, "vmem_limit": None,
            "min_grid": 1, "bf16_native": False}


def _softplus_pallas(x):
    """Elementwise softplus (beta=1) via a bandwidth-bound Pallas kernel."""
    orig_shape = x.shape
    dtype = x.dtype
    n = x.size
    if n == 0:
        return x
    if n % 128 != 0:
        # A pad + slice would add two extra full HBM passes; the fused XLA
        # expression is strictly faster for ragged element counts.
        return _softplus_ref(x)

    params = _chip_params()
    itemsize = jnp.dtype(dtype).itemsize
    sublane = max(8, 32 // itemsize)   # f32 -> 8, bf16 -> 16, int8/fp8 -> 32

    # Lane-dense slab: widest last dim (multiple of 128) that divides n while
    # leaving at least one full sublane-aligned row group.
    width = 128
    for w in (1024, 512, 256, 128):
        if n % w == 0 and n // w >= sublane:
            width = w
            break
    rows = n // width

    # Tile rows: largest sublane-aligned tile under the per-generation block
    # budget; on multi-TC chips keep the grid at >= min_grid steps so the
    # "parallel" axis can be sharded across cores.
    target_rows = max(
        sublane, (params["block_bytes"] // (width * itemsize)) // sublane * sublane
    )
    if params["min_grid"] > 1 and rows >= 2 * sublane:
        target_rows = min(
            target_rows, _round_up(pl.cdiv(rows, params["min_grid"]), sublane)
        )
    if rows <= target_rows:
        tile_rows = rows            # one block == the full array (always legal)
    else:
        tile_rows = target_rows     # sublane multiple; ragged last block is masked
    grid = pl.cdiv(rows, tile_rows)

    # bf16-native compute on chips with bf16 VPU/EUP; f32 upcast elsewhere.
    if dtype == jnp.bfloat16 and params["bf16_native"]:
        compute_dtype = dtype
    else:
        compute_dtype = jnp.float32

    x2d = x.reshape(rows, width)
    out2d = pl.pallas_call(
        functools.partial(_softplus_kernel, compute_dtype=compute_dtype),
        out_shape=jax.ShapeDtypeStruct((rows, width), dtype),
        grid_spec=pltpu.PrefetchScalarGridSpec(
            num_scalar_prefetch=0,
            grid=(grid,),
            in_specs=[pl.BlockSpec((tile_rows, width), lambda i: (i, 0))],
            out_specs=pl.BlockSpec((tile_rows, width), lambda i: (i, 0)),
        ),
        compiler_params=pltpu.CompilerParams(
            dimension_semantics=("parallel",),
            vmem_limit_bytes=params["vmem_limit"],
        ),
    )(x2d)
    return out2d.reshape(orig_shape)


def my_softplus(x):
    """MySoftplus.forward: torch.nn.Softplus(beta=1) applied elementwise."""
    nbytes = x.size * jnp.dtype(x.dtype).itemsize
    if x.size == 0 or x.size % 128 != 0 or nbytes < _MIN_KERNEL_BYTES:
        # Tiny or ragged tensors: let XLA fuse it (single HBM pass, no
        # standalone-kernel dispatch overhead).
        return _softplus_ref(x)
    return _softplus_pallas(x)


if __name__ == "__main__":
    key = jax.random.PRNGKey(0)
    k0, k1, k2, k3 = jax.random.split(key, 4)

    # 1) Small NCHW input consistent with the module's forward: kernel path.
    x = jax.random.normal(k0, (2, 4, 16, 16), dtype=jnp.float32) * 10.0
    y = _softplus_pallas(x)
    jax.block_until_ready(y)
    assert y.shape == x.shape and y.dtype == x.dtype
    assert jnp.allclose(y, _softplus_ref(x), atol=1e-5, rtol=1e-5), "f32 kernel mismatch"

    # 2) Moderate shape: exercises multi-step / ragged-block tiling where the
    #    per-generation tile is smaller than the slab.
    xb = jax.random.normal(k1, (4, 16, 128, 128), dtype=jnp.float32) * 10.0
    yb = _softplus_pallas(xb)
    jax.block_until_ready(yb)
    assert jnp.allclose(yb, _softplus_ref(xb), atol=1e-5, rtol=1e-5), "multi-block mismatch"

    # 3) bf16 input (native bf16 compute on v6e/v7x, f32 upcast on v5e).
    xh = (jax.random.normal(k2, (2, 4, 16, 16), dtype=jnp.float32) * 10.0).astype(jnp.bfloat16)
    yh = _softplus_pallas(xh)
    jax.block_until_ready(yh)
    assert yh.dtype == jnp.bfloat16
    assert jnp.allclose(
        yh.astype(jnp.float32), _softplus_ref(xh).astype(jnp.float32),
        atol=5e-2, rtol=5e-2,
    ), "bf16 kernel mismatch"

    # 4) Ragged element count routes to the fused fallback via the dispatcher.
    xr = jax.random.normal(k3, (2, 3, 17, 19), dtype=jnp.float32) * 10.0
    yr = my_softplus(xr)
    jax.block_until_ready(yr)
    assert jnp.allclose(yr, _softplus_ref(xr), atol=1e-5, rtol=1e-5), "fallback mismatch"

    print("KERNEL_OK")
</pallas_src>

<mosaic_0001>
module attributes {stable_mosaic.version = 11 : i64} {
  func.func @_softplus_kernel(%arg0: i32, %arg1: memref<8x256xf32, #tpu.memory_space<vmem>>, %arg2: memref<8x256xf32, #tpu.memory_space<vmem>>) attributes {dimension_semantics = [#tpu.dimension_semantics<parallel>], iteration_bounds = array<i64: 1>, scalar_prefetch = 0 : i64, scratch_operands = 0 : i64, tpu.core_type = #tpu.core_type<tc>, window_params = [{transform_indices = @transform_0, window_bounds = array<i64: 8, 256>}, {transform_indices = @transform_1, window_bounds = array<i64: 8, 256>}]} {
    %c0 = arith.constant 0 : index
    %c0_0 = arith.constant 0 : index
    %0 = vector.load %arg1[%c0, %c0_0] : memref<8x256xf32, #tpu.memory_space<vmem>>, vector<8x256xf32>
    %cst = arith.constant 2.000000e+01 : f32
    %1 = vector.broadcast %cst : f32 to vector<8x256xf32>
    %2 = arith.minimumf %0, %1 : vector<8x256xf32>
    %3 = math.exp %2 : vector<8x256xf32>
    %4 = math.log1p %3 : vector<8x256xf32>
    %cst_1 = arith.constant 2.000000e+01 : f32
    %5 = vector.broadcast %cst_1 : f32 to vector<8x256xf32>
    %6 = arith.cmpf ogt, %0, %5 : vector<8x256xf32>
    %7 = arith.select %6, %0, %4 : vector<8x256xi1>, vector<8x256xf32>
    %c0_2 = arith.constant 0 : index
    %c0_3 = arith.constant 0 : index
    %8 = vector.load %arg2[%c0_2, %c0_3] : memref<8x256xf32, #tpu.memory_space<vmem>>, vector<8x256xf32>
    tpu.vector_store %arg2[%c0_2, %c0_3], %7 {strides = array<i32>} : memref<8x256xf32, #tpu.memory_space<vmem>>, vector<8x256xf32>,
    return
  }
  func.func @transform_0(%arg0: i32) -> (i32, i32) {
    %c0_i32 = arith.constant 0 : i32
    %c0_i32_0 = arith.constant 0 : i32
    return %arg0, %c0_i32 : i32, i32
  }
  func.func @transform_1(%arg0: i32) -> (i32, i32) {
    %c0_i32 = arith.constant 0 : i32
    %c0_i32_0 = arith.constant 0 : i32
    return %arg0, %c0_i32 : i32, i32
  }
}

</mosaic_0001>

<bundles_post_ra>
// kernel: tpu_custom_call.1
= control target key start
LH: loop header
LB: loop body
LE: loop exit
PB: predicated region body
PF: predicated region fallthrough
CT: control target
= control target key end

     0   :  { %6 = vsyncpa [#allocation3], 0  ;;  %s152_s0 = inlined_call_operand.hbm [shape: f32[8,256], index: 0, kind: input, shape index: {}]   ;;  %s153_s1 = inlined_call_operand.hbm [shape: f32[8,256], index: 1, kind: output, shape index: {}]  }
   0x1   :  { %7 = vsyncpa [#allocation4], 0  ;;  %s13_s8 = sshll.u32 %s152_s0, 4  ;;  %s134_s9 = smov [#allocation2]   ;;  %s14_s8 = int_to_ptr.hbm [resolvable:$true] %s13_s8 }
   0x2   :  { %s15_s10 = sshll.u32 %s134_s9, 4  ;;  %s16_s10 = int_to_ptr.vmem [resolvable:$true] %s15_s10 }
   0x3   :  { %18 = dma.hbm_to_vmem [thread:$0]  %s14_s8, 256, %s16_s10, [#allocation3]  }
   0x4   :  { %130 = dma.done.wait [#allocation3], 256  }
   0x5   :  { %131 = vsyncadd [#allocation3], 4294967040  ;;  %v23_v0 = vld [vmem:[#allocation2] sm:$0xff]  ;;  %v24_v1 = vld [vmem:[#allocation2 + $0x8] sm:$0xff]  ;;  %s62_s12 = sshll.u32 %s153_s1, 4  ;;  %s135_s13 = smov [#allocation5]   ;;  %s63_s12 = int_to_ptr.hbm [resolvable:$true] %s62_s12 }
   0x6   :  { %v25_v2 = vmin.f32 %v23_v0, 20.0  ;;  %v26_v3 = vmin.f32 %v24_v1, 20.0  ;;  %vm49_vm1 = vcmp.gt.f32.partialorder %v23_v0, 20.0  ;;  %s60_s14 = sshll.u32 %s135_s13, 4  ;;  %vm50_vm3 = vcmp.gt.f32.partialorder %v24_v1, 20.0  ;;  %s61_s14 = int_to_ptr.vmem [resolvable:$true] %s60_s14 }
   0x8   :  { %v27_v4 = vmul.f32 1.442695, %v25_v2  ;;  %v29_v5 = vmul.f32 1.442695, %v26_v3 }
   0xa   :  { %74 = vpow2.f32 %v27_v4 }
   0xb   :  { %76 = vpow2.f32 %v29_v5 }
  0x10   :  { %v75_v6 = vpop.eup %74 }
  0x11   :  { %v77_v7 = vpop.eup %76  ;;  %v31_v8 = vadd.f32 1.0, %v75_v6  ;;  %v34_v9 = vmul.f32 -0.5, %v75_v6  ;;  %v37_v13 = vand.u32 2147483647, %v75_v6 }
  0x12   :  { %v40_v10 = vadd.f32 1.0, %v77_v7  ;;  %v43_v11 = vmul.f32 -0.5, %v77_v7  ;;  %v46_v15 = vand.u32 2147483647, %v77_v7 }
  0x13   :  { %78 = vlog2.f32 %v31_v8  ;;  %v35_v12 = vadd.f32 1.0, %v34_v9  ;;  %vm38_vm0 = vcmp.lt.f32.partialorder %v37_v13, 0.0004427343 }
  0x14   :  { %80 = vlog2.f32 %v40_v10  ;;  %v44_v14 = vadd.f32 1.0, %v43_v11  ;;  %vm47_vm2 = vcmp.lt.f32.partialorder %v46_v15, 0.0004427343 }
  0x15   :  { %v36_v16 = vmul.f32 %v75_v6, %v35_v12 }
  0x16   :  { %v45_v18 = vmul.f32 %v77_v7, %v44_v14 }
  0x19   :  { %v79_v17 = vpop.eup %78 }
  0x1a   :  { %v81_v19 = vpop.eup %80  ;;  %v33_v20 = vmul.f32 0.6931472, %v79_v17 }
  0x1b   :  { %v42_v21 = vmul.f32 0.6931472, %v81_v19 }
  0x1c   :  { %v39_v22 = vsel %vm38_vm0, %v36_v16, %v33_v20 }
  0x1d   :  { %v51_v23 = vsel %vm49_vm1, %v23_v0, %v39_v22  ;;  %v48_v24 = vsel %vm47_vm2, %v45_v18, %v42_v21 }
  0x1e   :  { %53 = vst [vmem:[#allocation5] sm:$0xff] %v51_v23  ;;  %v52_v25 = vsel %vm50_vm3, %v24_v1, %v48_v24 }
  0x1f   :  { %54 = vst [vmem:[#allocation5 + $0x8] sm:$0xff] %v52_v25 }
  0x20   :  { %65 = dma.vmem_to_hbm [thread:$0]  %s61_s14, 256, %s63_s12, [#allocation4]  }
  0x21   :  { %132 = dma.done.wait [#allocation4], 256  }
  0x22   :  { %133 = vsyncadd [#allocation4], 4294967040 }
  0x23   :  { %70 = vsyncpa [#allocation3], 1 }
  0x24   :  { %71 = vsyncpa [#allocation4], 1 }

</bundles_post_ra>
